<compile_context>
chip_gen: v6e
topology: v6e:2x2x1
jax: 0.10.0
libtpu: 0.0.40
codegen_flags: <defaults>
</compile_context>

<pallas_src>
import jax
import jax.numpy as jnp
from jax.experimental import pallas as pl
from jax.experimental.pallas import tpu as pltpu


# ----------------------------------------------------------------------------
# Glue: pytorch3d-style euler_angles_to_matrix (convention 'XYZ')
# ----------------------------------------------------------------------------
def _axis_angle_rotation(axis, angle):
    c = jnp.cos(angle)
    s = jnp.sin(angle)
    one = jnp.ones_like(angle)
    zero = jnp.zeros_like(angle)
    if axis == "X":
        flat = (one, zero, zero, zero, c, -s, zero, s, c)
    elif axis == "Y":
        flat = (c, zero, s, zero, one, zero, -s, zero, c)
    elif axis == "Z":
        flat = (c, -s, zero, s, c, zero, zero, zero, one)
    else:
        raise ValueError(axis)
    return jnp.stack(flat, axis=-1).reshape(angle.shape + (3, 3))


def euler_angles_to_matrix(euler_angles, convention="XYZ"):
    mats = [
        _axis_angle_rotation(c, euler_angles[..., i])
        for i, c in enumerate(convention)
    ]
    return mats[0] @ mats[1] @ mats[2]


def _round_up(x, m):
    return ((x + m - 1) // m) * m


def _pick_tile(n, tile_n):
    """Largest tile <= tile_n (multiple of 128) that still yields >= 2 grid
    steps when possible, so both v7x TensorCores get work."""
    n_ceil = _round_up(max(n, 1), 128)
    half = _round_up(-(-n_ceil // 2), 128)          # round_up(cdiv(n_ceil, 2), 128)
    return max(128, min(tile_n, half))


# ----------------------------------------------------------------------------
# Pose + bias folding (wrapper-side algebra on tiny matrices)
# ----------------------------------------------------------------------------
def _pack_pose_weights(rot_param, pose_param, w1, b1, w2, b2, w3, b3):
    """Fold the pose transform and all biases into augmented weight matrices.

      (p @ R - t) @ W1 + b1 == p @ (R @ W1) + (b1 - t @ W1)

    The point slab carries a homogeneous "ones" row; layer-1/2 LHS carry an
    extra [0, ..., 0, 1] row so that ReLU(1) = 1 regenerates the ones channel
    and downstream biases also ride the MXU contraction.
    """
    f32 = jnp.float32
    H = w1.shape[1]
    R = euler_angles_to_matrix(rot_param, "XYZ")[0]            # (3, 3)
    t = pose_param[:, :3]                                      # (1, 3)
    w1_eff = R @ w1                                            # (3, H)
    b1_eff = b1.reshape(1, H) - t @ w1                         # (1, H)

    w1a = jnp.concatenate(
        [jnp.concatenate([w1_eff.T, b1_eff.T], axis=1),        # (H, 4)
         jnp.array([[0.0, 0.0, 0.0, 1.0]], dtype=f32)],        # ones-channel row
        axis=0).astype(f32)                                    # (H+1, 4)

    w2a = jnp.concatenate(
        [jnp.concatenate([w2.T, b2.reshape(1, H).T], axis=1),  # (H, H+1)
         jnp.concatenate([jnp.zeros((1, H), f32),
                          jnp.ones((1, 1), f32)], axis=1)],    # ones-channel row
        axis=0).astype(f32)                                    # (H+1, H+1)

    w3a = jnp.concatenate(
        [w3.reshape(H, 1).T, b3.reshape(1, 1)], axis=1).astype(f32)   # (1, H+1)
    return w1a, w2a, w3a


# ----------------------------------------------------------------------------
# Pallas kernel: 3 MXU matmuls + 2 ReLUs on a lane-dense (feature, N) layout
# ----------------------------------------------------------------------------
def pose_sdf_kernel(pts_ref, w1a_ref, w2a_ref, w3a_ref, o_ref):
    pa = pts_ref[...]                                     # (4, tile): rows x, y, z, 1

    # layer 1: pose + bias folded into (H+1, 4) LHS; last row keeps ones channel
    h = jnp.dot(w1a_ref[...], pa, preferred_element_type=jnp.float32)   # (H+1, tile)
    h = jnp.maximum(h, 0.0)

    # layer 2: bias folded into (H+1, H+1) LHS via the ones channel
    h = jnp.dot(w2a_ref[...], h, preferred_element_type=jnp.float32)    # (H+1, tile)
    h = jnp.maximum(h, 0.0)

    # layer 3: (1, H+1) @ (H+1, tile) -> lane-dense (1, tile); b3 rides the dot
    o_ref[...] = jnp.dot(w3a_ref[...], h, preferred_element_type=jnp.float32)


# ----------------------------------------------------------------------------
# Wrappers
# ----------------------------------------------------------------------------
def prepare_points(points, *, tile_n=8192):
    """One-time packing of (N, 3) points into the kernel's planar (4, n_pad)
    layout (rows x, y, z, 1).  This is the only HBM pass over the point cloud
    besides the kernel itself; cache the result across forward calls with
    changing rot/pose to avoid re-paying it."""
    N = points.shape[0]
    tile = _pick_tile(N, tile_n)
    n_pad = _round_up(max(N, 1), tile)
    slab = jnp.concatenate(
        [points.astype(jnp.float32).T, jnp.ones((1, N), jnp.float32)], axis=0)
    if n_pad > N:
        slab = jnp.pad(slab, ((0, 0), (0, n_pad - N)))
    return slab, N, tile


def pose_sdf_forward_planar(pts_slab, tile, rot_param, pose_param, scale_param,
                            w1, b1, w2, b2, w3, b3):
    """pts_slab: (4, n_pad) planar points from prepare_points (n_pad % tile == 0).
    Returns the lane-dense (1, n_pad) SDF slab; caller trims the padded tail.

    scale_param is accepted to mirror the module signature but (like the
    original forward) is not applied.
    """
    del scale_param  # not used by PoseSDF.forward
    H = w1.shape[1]
    n_pad = pts_slab.shape[1]
    w1a, w2a, w3a = _pack_pose_weights(rot_param, pose_param, w1, b1, w2, b2, w3, b3)

    const = lambda i: (0, 0)
    grid_spec = pltpu.PrefetchScalarGridSpec(
        num_scalar_prefetch=0,
        grid=(n_pad // tile,),
        in_specs=[
            pl.BlockSpec((4, tile), lambda i: (0, i)),     # planar points + ones row
            pl.BlockSpec((H + 1, 4), const),               # [W1_eff^T | b1_eff; 0 0 0 1]
            pl.BlockSpec((H + 1, H + 1), const),           # [W2^T | b2; 0..0 1]
            pl.BlockSpec((1, H + 1), const),               # [W3^T | b3]
        ],
        out_specs=pl.BlockSpec((1, tile), lambda i: (0, i)),   # lane-dense output
    )
    return pl.pallas_call(
        pose_sdf_kernel,
        out_shape=jax.ShapeDtypeStruct((1, n_pad), jnp.float32),
        grid_spec=grid_spec,
        compiler_params=pltpu.CompilerParams(
            dimension_semantics=("parallel",)),            # shard steps across TCs
    )(pts_slab, w1a, w2a, w3a)


def pose_sdf_forward(points, rot_param, pose_param, scale_param,
                     w1, b1, w2, b2, w3, b3, *, tile_n=8192):
    """Convenience path mirroring the module: points (N, 3) -> sdf (N, 1).
    Pays the planar packing pass on every call; for repeated evaluation of the
    same point set under changing pose, use prepare_points + the planar path."""
    slab, N, tile = prepare_points(points, tile_n=tile_n)
    out = pose_sdf_forward_planar(slab, tile, rot_param, pose_param, scale_param,
                                  w1, b1, w2, b2, w3, b3)
    return out[0, :N].reshape(N, 1)


# Pure-JAX reference for correctness checking (no folding; mirrors the module).
def ref_forward(points, rot_param, pose_param, w1, b1, w2, b2, w3, b3):
    R = euler_angles_to_matrix(rot_param, "XYZ")[0]
    tp = points @ R - pose_param[:, :3]
    h = jax.nn.relu(tp @ w1 + b1.reshape(1, -1))
    h = jax.nn.relu(h @ w2 + b2.reshape(1, -1))
    return h @ w3 + b3.reshape(1, 1)


if __name__ == "__main__":
    key = jax.random.PRNGKey(0)
    N, H = 4096, 32

    (k_pts, k_rot, k_pose, k1, k2, k3,
     kb1, kb2, kb3, k_rot2, k_pose2) = jax.random.split(key, 11)

    # Learnable PoseSDF parameters (the module inits them to zeros/ones; use
    # nonzero values here so the rotation/translation fold is actually tested).
    rot = jax.random.normal(k_rot, (1, 3), jnp.float32) * 0.5
    pose = jax.random.normal(k_pose, (1, 6), jnp.float32) * 0.5
    scale = jnp.ones((1, 3), jnp.float32)   # present on the module, unused in forward

    # TODO(synk): the module's implicit_fn is user-supplied; modeled here as a
    # small deterministic 3 -> H -> H -> 1 ReLU MLP SDF.
    w1 = jax.random.normal(k1, (3, H), jnp.float32) / jnp.sqrt(3.0)
    b1 = jax.random.normal(kb1, (1, H), jnp.float32) * 0.01
    w2 = jax.random.normal(k2, (H, H), jnp.float32) / jnp.sqrt(float(H))
    b2 = jax.random.normal(kb2, (1, H), jnp.float32) * 0.01
    w3 = jax.random.normal(k3, (H, 1), jnp.float32) / jnp.sqrt(float(H))
    b3 = jax.random.normal(kb3, (1,), jnp.float32) * 0.01

    points = jax.random.normal(k_pts, (N, 3), jnp.float32)

    # Convenience (N, 3) -> (N, 1) path.
    out = jax.block_until_ready(
        pose_sdf_forward(points, rot, pose, scale, w1, b1, w2, b2, w3, b3))
    ref = ref_forward(points, rot, pose, w1, b1, w2, b2, w3, b3)
    assert out.shape == (N, 1)
    assert jnp.allclose(out, ref, atol=1e-4, rtol=1e-4)

    # Ragged point count exercises the padding path (grid still has 2 steps).
    Nr = 777
    pts_r = jax.random.normal(k_pts, (Nr, 3), jnp.float32)
    out_r = jax.block_until_ready(
        pose_sdf_forward(pts_r, rot, pose, scale, w1, b1, w2, b2, w3, b3))
    ref_r = ref_forward(pts_r, rot, pose, w1, b1, w2, b2, w3, b3)
    assert out_r.shape == (Nr, 1)
    assert jnp.allclose(out_r, ref_r, atol=1e-4, rtol=1e-4)

    # Cached planar path: pack the points ONCE, evaluate two different poses
    # without re-paying the transpose/pad HBM pass or the output slice copy.
    slab, n_valid, tile = prepare_points(points)
    rot2 = jax.random.normal(k_rot2, (1, 3), jnp.float32) * 0.3
    pose2 = jax.random.normal(k_pose2, (1, 6), jnp.float32) * 0.3
    for r, p in ((rot, pose), (rot2, pose2)):
        slab_out = jax.block_until_ready(
            pose_sdf_forward_planar(slab, tile, r, p, scale,
                                    w1, b1, w2, b2, w3, b3))
        ref_i = ref_forward(points, r, p, w1, b1, w2, b2, w3, b3)
        assert slab_out.shape[1] % tile == 0
        assert jnp.allclose(slab_out[0, :n_valid].reshape(N, 1), ref_i,
                            atol=1e-4, rtol=1e-4)

    print("KERNEL_OK")
</pallas_src>

<mosaic_0001>
module attributes {stable_mosaic.version = 11 : i64} {
  func.func @pose_sdf_kernel(%arg0: i32, %arg1: memref<4x2048xf32, #tpu.memory_space<vmem>>, %arg2: memref<33x4xf32, #tpu.memory_space<vmem>>, %arg3: memref<33x33xf32, #tpu.memory_space<vmem>>, %arg4: memref<1x33xf32, #tpu.memory_space<vmem>>, %arg5: memref<1x2048xf32, #tpu.memory_space<vmem>>) attributes {dimension_semantics = [#tpu.dimension_semantics<parallel>], iteration_bounds = array<i64: 2>, scalar_prefetch = 0 : i64, scratch_operands = 0 : i64, tpu.core_type = #tpu.core_type<tc>, window_params = [{transform_indices = @transform_0, window_bounds = array<i64: 4, 2048>}, {pipeline_mode = #tpu.pipeline_mode<synchronous>, transform_indices = @transform_1, window_bounds = array<i64: 33, 4>}, {pipeline_mode = #tpu.pipeline_mode<synchronous>, transform_indices = @transform_2, window_bounds = array<i64: 33, 33>}, {pipeline_mode = #tpu.pipeline_mode<synchronous>, transform_indices = @transform_3, window_bounds = array<i64: 1, 33>}, {transform_indices = @transform_4, window_bounds = array<i64: 1, 2048>}]} {
    %c0 = arith.constant 0 : index
    %c0_0 = arith.constant 0 : index
    %0 = vector.load %arg1[%c0, %c0_0] : memref<4x2048xf32, #tpu.memory_space<vmem>>, vector<4x2048xf32>
    %c0_1 = arith.constant 0 : index
    %c0_2 = arith.constant 0 : index
    %1 = vector.load %arg2[%c0_1, %c0_2] : memref<33x4xf32, #tpu.memory_space<vmem>>, vector<33x4xf32>
    %cst = arith.constant dense<0.000000e+00> : vector<33x2048xf32>
    %2 = tpu.matmul %1, %0, %cst {dimension_numbers = #tpu.dot_dimension_numbers<[1], [0], [0], [1], [0, 0, 1, 1], [], []>} : vector<33x4xf32>, vector<4x2048xf32>, vector<33x2048xf32> -> vector<33x2048xf32>
    %cst_3 = arith.constant 0.000000e+00 : f32
    %3 = vector.broadcast %cst_3 : f32 to vector<33x2048xf32>
    %4 = arith.maximumf %2, %3 : vector<33x2048xf32>
    %c0_4 = arith.constant 0 : index
    %c0_5 = arith.constant 0 : index
    %5 = vector.load %arg3[%c0_4, %c0_5] : memref<33x33xf32, #tpu.memory_space<vmem>>, vector<33x33xf32>
    %cst_6 = arith.constant dense<0.000000e+00> : vector<33x2048xf32>
    %6 = tpu.matmul %5, %4, %cst_6 {dimension_numbers = #tpu.dot_dimension_numbers<[1], [0], [0], [1], [0, 0, 1, 1], [], []>} : vector<33x33xf32>, vector<33x2048xf32>, vector<33x2048xf32> -> vector<33x2048xf32>
    %cst_7 = arith.constant 0.000000e+00 : f32
    %7 = vector.broadcast %cst_7 : f32 to vector<33x2048xf32>
    %8 = arith.maximumf %6, %7 : vector<33x2048xf32>
    %c0_8 = arith.constant 0 : index
    %c0_9 = arith.constant 0 : index
    %9 = vector.load %arg4[%c0_8, %c0_9] : memref<1x33xf32, #tpu.memory_space<vmem>>, vector<1x33xf32>
    %cst_10 = arith.constant dense<0.000000e+00> : vector<1x2048xf32>
    %10 = tpu.matmul %9, %8, %cst_10 {dimension_numbers = #tpu.dot_dimension_numbers<[1], [0], [0], [1], [0, 0, 1, 1], [], []>} : vector<1x33xf32>, vector<33x2048xf32>, vector<1x2048xf32> -> vector<1x2048xf32>
    %c0_11 = arith.constant 0 : index
    %c0_12 = arith.constant 0 : index
    %11 = vector.load %arg5[%c0_11, %c0_12] : memref<1x2048xf32, #tpu.memory_space<vmem>>, vector<1x2048xf32>
    tpu.vector_store %arg5[%c0_11, %c0_12], %10 {strides = array<i32>} : memref<1x2048xf32, #tpu.memory_space<vmem>>, vector<1x2048xf32>,
    return
  }
  func.func @transform_0(%arg0: i32) -> (i32, i32) {
    %c0_i32 = arith.constant 0 : i32
    %c0_i32_0 = arith.constant 0 : i32
    return %c0_i32, %arg0 : i32, i32
  }
  func.func @transform_1(%arg0: i32) -> (i32, i32) {
    %c0_i32 = arith.constant 0 : i32
    %c0_i32_0 = arith.constant 0 : i32
    %c0_i32_1 = arith.constant 0 : i32
    return %c0_i32, %c0_i32_0 : i32, i32
  }
  func.func @transform_2(%arg0: i32) -> (i32, i32) {
    %c0_i32 = arith.constant 0 : i32
    %c0_i32_0 = arith.constant 0 : i32
    %c0_i32_1 = arith.constant 0 : i32
    return %c0_i32, %c0_i32_0 : i32, i32
  }
  func.func @transform_3(%arg0: i32) -> (i32, i32) {
    %c0_i32 = arith.constant 0 : i32
    %c0_i32_0 = arith.constant 0 : i32
    %c0_i32_1 = arith.constant 0 : i32
    return %c0_i32, %c0_i32_0 : i32, i32
  }
  func.func @transform_4(%arg0: i32) -> (i32, i32) {
    %c0_i32 = arith.constant 0 : i32
    %c0_i32_0 = arith.constant 0 : i32
    return %c0_i32, %arg0 : i32, i32
  }
}

</mosaic_0001>

<bundles_post_ra>
// kernel: tpu_custom_call.1
= control target key start
LH: loop header
LB: loop body
LE: loop exit
PB: predicated region body
PF: predicated region fallthrough
CT: control target
= control target key end

     0   :  { %9 = vsyncpa [#allocation3], 0  ;;  %s3885_s0 = inlined_call_operand.hbm [shape: f32[4,4096], index: 0, kind: input, shape index: {}]   ;;  %s3886_s1 = inlined_call_operand.vmem [shape: f32[33,4], index: 1, kind: input, shape index: {}]   ;;  %s3887_s2 = inlined_call_operand.vmem [shape: f32[33,33], index: 2, kind: input, shape index: {}]   ;;  %s3888_s3 = inlined_call_operand.vmem [shape: f32[1,33], index: 3, kind: input, shape index: {}]   ;;  %s3889_s4 = inlined_call_operand.hbm [shape: f32[1,4096], index: 4, kind: output, shape index: {}]  }
   0x1   :  { %11 = vsyncpa [#allocation3 + $0x1], 0 }
   0x2   :  { %12 = vsyncpa [#allocation4], 0 }
   0x3   :  { %14 = vsyncpa [#allocation4 + $0x1], 0  ;;  %s3198_s15 = smov 0   ;;  %s3200_s16 = smov 0  }
   0x4   :  { %s3202_s17 = smov 0   ;;  %s3204_s18 = smov 0  }
   0x5 LB: > { %s3219_s19 = sadd.s32 4294967295, %s3167_s18   ;;  %s2867_s20 = sadd.s32 4294967294, %s3167_s18   ;;  %s3167_s18 = sphi %s3204_s18, %s3906_s18   ;;  %s3163_s17 = sphi %s3202_s17, %s3905_s17   ;;  %s3159_s16 = sphi %s3200_s16, %s3904_s16   ;;  %s3155_s15 = sphi %s3198_s15, %s3903_s15  }
   0x6   : > { %s3223_s21 = sadd.s32 1, %s3167_s18   ;;  %s27_s22 = sadd.s32 1, %s3163_s17 }
   0x7   : > { %s24_s23 = ssub.s32 %s3167_s18, %s3223_s21  ;;  %p34_p0 = scmp.ne.s32.totalorder %s3163_s17, %s3159_s16 }
   0x8   : > { %p25_p1 = scmp.eq.s32.totalorder %s24_s23, 0  ;;  %p35_p2 = scmp.eq.s32.totalorder %s3167_s18, 0 }
   0x9   : > { %p40_p3 = scmp.ne.s32.totalorder %s3159_s16, %s3155_s15  ;;  %p41_p4 = scmp.eq.s32.totalorder %s3219_s19, 0 }
   0xa   : > { %s3235_s24 = scalar_select %p25_p1, %s3163_s17, %s27_s22  }
   0xb   : > { %p3237_p5 = por %p35_p2, %p34_p0  ;;  %p3241_p6 = por %p41_p4, %p40_p3 }
   0xc   : > { %p127_p7 = scmp.eq.s32.totalorder %s3219_s19, 1  ;;  %p133_p8 = scmp.eq.s32.totalorder %s2867_s20, 1 }
   0xd   : > { %s3893_s26 = scalar_select %p3241_p6, 1, 0 }
   0xe   : > { %p3031_p10 = scmp.lt.s32.totalorder %s3167_s18, 2  ;;  %p3248_p11 = por %p127_p7, %p34_p0 }
   0xf   : > { %p3252_p12 = por %p133_p8, %p40_p3  ;;  %s162_s29 = sand.u32 1, %s3163_s17  }
  0x10   : > { %s3894_s27 = scalar_select %p3248_p11, 1, 0 }
  0x11   : > { %s3895_s28 = scalar_select %p3252_p12, 1, 0 }
  0x12   : > { %s3017_s30 = sshll.u32 %s3167_s18, 10  ;;  %s2870_s5 = sshll.u32 %s162_s29, 6 }
  0x13   : > { %s3261_s8 = scalar_lea.hbm %s3885_s0, %s3017_s30  ;;  %s166_s9 = scalar_lea.vmem [#allocation2], %s2870_s5 }
  0x14   : > { %s174_s10 = sshll.u32 %s166_s9, 4  ;;  %p3265_p13 = pnand %p3031_p10, %p3237_p5  ;;  %s3269_s10 = int_to_ptr.vmem [resolvable:$true] %s174_s10 }
  0x15   : > { %s163_s12 = scalar_lea.sflag [#allocation3], %s162_s29  ;;  %s3075_s13 = scalar_lea.hbm %s3261_s8, 1024 }
  0x16   : > { %p3076_p2 = scmp.ne.s32.totalorder %s3261_s8, %s3075_s13  ;;  %p3077_p3 = pneg %p3265_p13 }
  0x17   : > { %s3080_s22 = scalar_lea.hbm %s3885_s0, 2048  ;;  %p3081_p5 = scmp.lt.s32.totalorder %s3261_s8, %s3885_s0 }
  0x18   : > { %p3078_p4 = pnand %p3077_p3, %p3076_p2  ;;  %p3082_p8 = scmp.lt.s32.totalorder %s3080_s22, %s3075_s13 }
  0x1a   : > { %p3079_p7 = pneg %p3078_p4  ;;  %p3083_p10 = por %p3082_p8, %p3081_p5 }
  0x1c   : > { %p3084_p9 = pnand %p3083_p10, %p3079_p7 }
  0x1e   : > { %3087 = shalt.err (!%p3084_p9)
}
  0x1f   : > { %s3088_s29 = scalar_lea.vmem %s3269_s10, 1024  ;;  %s3169_s30 = smov [#allocation2]  }
  0x20   : > { %p3089_p0 = scmp.ne.s32.totalorder %s3269_s10, %s3088_s29  ;;  %s3093_s5 = sshll.u32 %s3169_s30, 4  ;;  %s3094_s5 = int_to_ptr.vmem [resolvable:$false] %s3093_s5 }
  0x21   : > { %s3095_s6 = scalar_lea.vmem %s3094_s5, 2048  ;;  %p3096_p4 = scmp.lt.s32.totalorder %s3269_s10, %s3094_s5 }
  0x22   : > { %p3091_p1 = pnand %p3089_p0, %p3077_p3  ;;  %p3097_p12 = scmp.lt.s32.totalorder %s3095_s6, %s3088_s29 }
  0x24   : > { %p3092_p2 = pneg %p3091_p1  ;;  %p3098_p11 = por %p3097_p12, %p3096_p4 }
  0x26   : > { %p3099_p6 = pnand %p3098_p11, %p3092_p2 }
  0x28   : > { %3102 = shalt.err (!%p3099_p6)
}
  0x29   : > { %3026 = dma.hbm_to_vmem [thread:$0]  (!%p3265_p13), %s3261_s8, 1024, %s3269_s10, %s163_s12  }
  0x2a   : > { %p3897_p9 = scmp.lt.s32.totalorder %s3167_s18, 3  ;;  %p3898_p7 = scmp.ge.s32.totalorder %s3167_s18, 1 }
  0x2c   : > { %p180_p0 = pnand %p3898_p7, %p3897_p9 }
  0x2d   : > { %s3296_s7 = sand.u32 (!%p180_p0), 1, %s3159_s16   ;;  %p3899_p6 = scmp.ne.s32.totalorder (!%p180_p0), %s3893_s26, 0 }
  0x2e   : > { %183 = sbr.rel (%p180_p0) target bundleno = 789 (0x315), region = 36  ;;  %s2874_s9 = sshll.u32 (!%p180_p0), %s3296_s7, 6 }
  0x2f   : > { %s186_s13 = scalar_lea.sflag (!%p180_p0), [#allocation3], %s3296_s7  ;;  %s3300_s14 = scalar_lea.vmem (!%p180_p0), [#allocation2], %s2874_s9 }
  0x33   : > { %3146 = dma.done.wait (%p3899_p6), %s186_s13, 1024  }
  0x34   : > { %3148 = vsyncadd (%p3899_p6), %s186_s13, 4294966272  ;;  %v3170_v0 = vmov 0.0   ;;  %v216_v1 = vld [vmem:[%s3300_s14] sm:$0xff]  ;;  %vm261_vm0 = vcmask 1043456   ;;  %v217_v2 = vld [vmem:[%s3300_s14 + $0x8] sm:$0xff]  ;;  %vm245_vm1 = vcmask 31744  }
  0x35   : > { %358 = vmatprep.mubr.f32.mxu0 %v3170_v0  ;;  %453 = vmatprep.mubr.f32.mxu1 %v3170_v0  ;;  %v237_v3 = vcombine.high %v216_v1, %v216_v1  ;;  %v238_v4 = vcombine.high %v217_v2, %v217_v2  ;;  %v218_v5 = vld [vmem:[%s3300_s14 + $0x10] sm:$0xff]  ;;  %v3314_v6 = vld [vmem:[%s3886_s1] sm:$0xff]  ;;  %v219_v7 = vld [vmem:[%s3300_s14 + $0x18] sm:$0xff]  ;;  %vm1155_vm2 = vcmask 1040384   ;;  %vm1139_vm3 = vcmask 269312   ;;  %s2875_s22 = sshll.u32 %s3296_s7, 4 }
  0x36   : > { %v239_v8 = vcombine.high %v218_v5, %v218_v5  ;;  %v240_v9 = vcombine.high %v219_v7, %v219_v7  ;;  %v220_v10 = vld [vmem:[%s3300_s14 + $0x20] sm:$0xff]  ;;  %v221_v11 = vld [vmem:[%s3300_s14 + $0x28] sm:$0xff]  ;;  %v3347_v15 = vld [vmem:[%s3886_s1 + $0x10] sm:$0xff]  ;;  %s213_s23 = scalar_lea.vmem [#allocation5], %s2875_s22  ;;  %s3018_s25 = sshll.u32 %s3219_s19, 8 }
  0x37   : > { %2876 = vmatprep.subr.msk.mxu0 %vm261_vm0, %v237_v3  ;;  %2883 = vmatprep.subr.msk.mxu1 %vm261_vm0, %v238_v4  ;;  %v3332_v12 = vld [vmem:[%s3886_s1 + $0x8] sm:$0xff]  ;;  %v241_v13 = vcombine.high %v220_v10, %v220_v10  ;;  %v242_v14 = vcombine.high %v221_v11, %v221_v11  ;;  %v3360_v16 = vld [vmem:[%s3886_s1 + $0x18] sm:$0xff]  ;;  %v3371_v17 = vld [vmem:[%s3886_s1 + $0x20] sm:$0x1]  ;;  %s2797_s29 = sshll.u32 %s213_s23, 4  ;;  %s2795_s6 = scalar_lea.hbm %s3889_s4, %s3018_s25  ;;  %s2798_s29 = int_to_ptr.vmem [resolvable:$true] %s2797_s29 }
  0x38   : > { %2877 = vmatpush1.msk.msra.mxu0 %vm261_vm0, %v216_v1  ;;  %2884 = vmatpush1.msk.msra.mxu1 %vm261_vm0, %v217_v2  ;;  %v222_v18 = vld [vmem:[%s3300_s14 + $0x30] sm:$0xff]  ;;  %v223_v19 = vld [vmem:[%s3300_s14 + $0x38] sm:$0xff]  ;;  %s2783_s9 = scalar_lea.sflag [#allocation4], %s3296_s7  ;;  %s3103_s13 = scalar_lea.vmem %s2798_s29, 256 }
  0x39   : > { %2878 = vmatmul.mubr.msk.f32.vlgmr.msra.gmra.mxu0 %vm245_vm1, %v3314_v6  ;;  %2885 = vmatmul.mubr.msk.f32.vlgmr.msra.gmra.mxu1 %vm245_vm1, %v3314_v6  ;;  %v243_v20 = vcombine.high %v222_v18, %v222_v18  ;;  %v244_v21 = vcombine.high %v223_v19, %v223_v19  ;;  %p3104_p11 = scmp.ne.s32.totalorder %s2798_s29, %s3103_s13  ;;  %p3900_p12 = scmp.ne.s32.totalorder %s3894_s27, 0 }
  0x3a   : > { %364 = vmatprep.mubr.f32.mxu0 %v3170_v0  ;;  %459 = vmatprep.mubr.f32.mxu1 %v3170_v0  ;;  %s3172_s14 = smov [#allocation5]  }
  0x3b   : > { %2890 = vmatprep.subr.msk.mxu0 %vm261_vm0, %v239_v8  ;;  %2897 = vmatprep.subr.msk.mxu1 %vm261_vm0, %v240_v9  ;;  %v3516_v9 = vld [vmem:[%s3887_s2] sm:$0xff]  ;;  %p3105_p13 = pnand %p3104_p11, %p3900_p12  ;;  %s3107_s8 = sshll.u32 %s3172_s14, 4  ;;  %s3108_s8 = int_to_ptr.vmem [resolvable:$false] %s3107_s8 }
  0x3c   : > { %2891 = vmatpush1.msk.msra.mxu0 %vm261_vm0, %v218_v5  ;;  %2898 = vmatpush1.msk.msra.mxu1 %vm261_vm0, %v219_v7  ;;  %s3109_s19 = scalar_lea.vmem %s3108_s8, 512  ;;  %p3110_p3 = scmp.lt.s32.totalorder %s2798_s29, %s3108_s8 }
  0x3d   : > { %2879 = vmatmul.mubr.msk.f32.gmra.mxu0 %vm245_vm1, %v3332_v12  ;;  %2886 = vmatmul.mubr.msk.f32.gmra.mxu1 %vm245_vm1, %v3332_v12  ;;  %p3106_p1 = pneg %p3105_p13  ;;  %p3111_p5 = scmp.lt.s32.totalorder %s3109_s19, %s3103_s13 }
  0x3e   : > { %370 = vmatprep.mubr.f32.mxu0 %v3170_v0  ;;  %465 = vmatprep.mubr.f32.mxu1 %v3170_v0 }
  0x3f   : > { %2904 = vmatprep.subr.msk.mxu0 %vm261_vm0, %v241_v13  ;;  %2911 = vmatprep.subr.msk.mxu1 %vm261_vm0, %v242_v14  ;;  %v3527_v14 = vld [vmem:[%s3887_s2 + $0x8] sm:$0xff]  ;;  %p3112_p8 = por %p3111_p5, %p3110_p3 }
  0x41   : > { %2880 = vmatmul.mubr.msk.f32.gmra.mxu0 %vm245_vm1, %v3347_v15  ;;  %2887 = vmatmul.mubr.msk.f32.gmra.mxu1 %vm245_vm1, %v3347_v15  ;;  %p3113_p10 = pnand %p3112_p8, %p3106_p1 }
  0x42   : > { %376 = vmatprep.mubr.f32.mxu0 %v3170_v0  ;;  %471 = vmatprep.mubr.f32.mxu1 %v3170_v0 }
  0x45   : > { %2881 = vmatmul.mubr.msk.f32.gmra.mxu0 %vm245_vm1, %v3360_v16  ;;  %2888 = vmatmul.mubr.msk.f32.gmra.mxu1 %vm245_vm1, %v3360_v16 }
  0x46   : > { %382 = vmatprep.mubr.f32.mxu0 %v3170_v0  ;;  %477 = vmatprep.mubr.f32.mxu1 %v3170_v0 }
  0x49   : > { %2882 = vmatmul.mubr.msk.f32.gmra.mxu0 %vm245_vm1, %v3371_v17  ;;  %2889 = vmatmul.mubr.msk.f32.gmra.mxu1 %vm245_vm1, %v3371_v17 }
  0x4a   : > { %548 = vmatprep.mubr.f32.mxu0 %v3170_v0  ;;  %643 = vmatprep.mubr.f32.mxu1 %v3170_v0 }
  0x4d   : > { %2892 = vmatmul.mubr.msk.f32.vlgmr.msra.gmra.mxu0 %vm245_vm1, %v3314_v6  ;;  %2899 = vmatmul.mubr.msk.f32.vlgmr.msra.gmra.mxu1 %vm245_vm1, %v3314_v6 }
  0x4e   : > { %554 = vmatprep.mubr.f32.mxu0 %v3170_v0  ;;  %649 = vmatprep.mubr.f32.mxu1 %v3170_v0 }
  0x4f   : > { %2905 = vmatpush1.msk.msra.mxu0 %vm261_vm0, %v220_v10  ;;  %2912 = vmatpush1.msk.msra.mxu1 %vm261_vm0, %v221_v11 }
  0x50   : > { %2918 = vmatprep.subr.msk.mxu0 %vm261_vm0, %v243_v20  ;;  %2925 = vmatprep.subr.msk.mxu1 %vm261_vm0, %v244_v21 }
  0x51   : > { %2893 = vmatmul.mubr.msk.f32.gmra.mxu0 %vm245_vm1, %v3332_v12  ;;  %2900 = vmatmul.mubr.msk.f32.gmra.mxu1 %vm245_vm1, %v3332_v12 }
  0x52   : > { %560 = vmatprep.mubr.f32.mxu0 %v3170_v0  ;;  %655 = vmatprep.mubr.f32.mxu1 %v3170_v0 }
  0x55   : > { %2894 = vmatmul.mubr.msk.f32.gmra.mxu0 %vm245_vm1, %v3347_v15  ;;  %2901 = vmatmul.mubr.msk.f32.gmra.mxu1 %vm245_vm1, %v3347_v15 }
  0x56   : > { %566 = vmatprep.mubr.f32.mxu0 %v3170_v0  ;;  %661 = vmatprep.mubr.f32.mxu1 %v3170_v0 }
  0x59   : > { %2895 = vmatmul.mubr.msk.f32.gmra.mxu0 %vm245_vm1, %v3360_v16  ;;  %2902 = vmatmul.mubr.msk.f32.gmra.mxu1 %vm245_vm1, %v3360_v16 }
  0x5a   : > { %572 = vmatprep.mubr.f32.mxu0 %v3170_v0  ;;  %667 = vmatprep.mubr.f32.mxu1 %v3170_v0 }
  0x5d   : > { %2896 = vmatmul.mubr.msk.f32.gmra.mxu0 %vm245_vm1, %v3371_v17  ;;  %2903 = vmatmul.mubr.msk.f32.gmra.mxu1 %vm245_vm1, %v3371_v17 }
  0x5e   : > { %738 = vmatprep.mubr.f32.mxu0 %v3170_v0  ;;  %833 = vmatprep.mubr.f32.mxu1 %v3170_v0 }
  0x61   : > { %2906 = vmatmul.mubr.msk.f32.vlgmr.msra.gmra.mxu0 %vm245_vm1, %v3314_v6  ;;  %2913 = vmatmul.mubr.msk.f32.vlgmr.msra.gmra.mxu1 %vm245_vm1, %v3314_v6 }
  0x62   : > { %744 = vmatprep.mubr.f32.mxu0 %v3170_v0  ;;  %839 = vmatprep.mubr.f32.mxu1 %v3170_v0 }
  0x63   : > { %2919 = vmatpush1.msk.msra.mxu0 %vm261_vm0, %v222_v18  ;;  %2926 = vmatpush1.msk.msra.mxu1 %vm261_vm0, %v223_v19  ;;  %v3538_v19 = vld [vmem:[%s3887_s2 + $0x10] sm:$0xff] }
  0x65   : > { %2907 = vmatmul.mubr.msk.f32.gmra.mxu0 %vm245_vm1, %v3332_v12  ;;  %2914 = vmatmul.mubr.msk.f32.gmra.mxu1 %vm245_vm1, %v3332_v12 }
  0x66   : > { %750 = vmatprep.mubr.f32.mxu0 %v3170_v0  ;;  %845 = vmatprep.mubr.f32.mxu1 %v3170_v0 }
  0x69   : > { %2908 = vmatmul.mubr.msk.f32.gmra.mxu0 %vm245_vm1, %v3347_v15  ;;  %2915 = vmatmul.mubr.msk.f32.gmra.mxu1 %vm245_vm1, %v3347_v15 }
  0x6a   : > { %756 = vmatprep.mubr.f32.mxu0 %v3170_v0  ;;  %851 = vmatprep.mubr.f32.mxu1 %v3170_v0 }
  0x6d   : > { %2909 = vmatmul.mubr.msk.f32.gmra.mxu0 %vm245_vm1, %v3360_v16  ;;  %2916 = vmatmul.mubr.msk.f32.gmra.mxu1 %vm245_vm1, %v3360_v16 }
  0x6e   : > { %762 = vmatprep.mubr.f32.mxu0 %v3170_v0  ;;  %857 = vmatprep.mubr.f32.mxu1 %v3170_v0 }
  0x71   : > { %2910 = vmatmul.mubr.msk.f32.gmra.mxu0 %vm245_vm1, %v3371_v17  ;;  %2917 = vmatmul.mubr.msk.f32.gmra.mxu1 %vm245_vm1, %v3371_v17 }
  0x72   : > { %928 = vmatprep.mubr.f32.mxu0 %v3170_v0  ;;  %1023 = vmatprep.mubr.f32.mxu1 %v3170_v0 }
  0x75   : > { %2920 = vmatmul.mubr.msk.f32.vlgmr.msra.gmra.mxu0 %vm245_vm1, %v3314_v6  ;;  %2927 = vmatmul.mubr.msk.f32.vlgmr.msra.gmra.mxu1 %vm245_vm1, %v3314_v6 }
  0x76   : > { %934 = vmatprep.mubr.f32.mxu0 %v3170_v0  ;;  %1029 = vmatprep.mubr.f32.mxu1 %v3170_v0 }
  0x79   : > { %2921 = vmatmul.mubr.msk.f32.gmra.mxu0 %vm245_vm1, %v3332_v12  ;;  %2928 = vmatmul.mubr.msk.f32.gmra.mxu1 %vm245_vm1, %v3332_v12 }
  0x7a   : > { %940 = vmatprep.mubr.f32.mxu0 %v3170_v0  ;;  %1035 = vmatprep.mubr.f32.mxu1 %v3170_v0 }
  0x7d   : > { %2922 = vmatmul.mubr.msk.f32.gmra.mxu0 %vm245_vm1, %v3347_v15  ;;  %2929 = vmatmul.mubr.msk.f32.gmra.mxu1 %vm245_vm1, %v3347_v15 }
  0x7e   : > { %946 = vmatprep.mubr.f32.mxu0 %v3170_v0  ;;  %1041 = vmatprep.mubr.f32.mxu1 %v3170_v0 }
  0x81   : > { %2923 = vmatmul.mubr.msk.f32.gmra.mxu0 %vm245_vm1, %v3360_v16  ;;  %2930 = vmatmul.mubr.msk.f32.gmra.mxu1 %vm245_vm1, %v3360_v16 }
  0x82   : > { %952 = vmatprep.mubr.f32.mxu0 %v3170_v0  ;;  %1047 = vmatprep.mubr.f32.mxu1 %v3170_v0 }
  0x85   : > { %2924 = vmatmul.mubr.msk.f32.gmra.mxu0 %vm245_vm1, %v3371_v17  ;;  %2931 = vmatmul.mubr.msk.f32.gmra.mxu1 %vm245_vm1, %v3371_v17 }
  0x86   : > { %1268 = vmatprep.mubr.f32.mxu0 %v3170_v0  ;;  %1363 = vmatprep.mubr.f32.mxu1 %v3170_v0 }
  0xf9   : > { %v3477_v22 = vpop.f32.mrf.mxu0  ;;  %v3479_v23 = vpop.f32.mrf.mxu1 }
  0xfa   : > { %v1054_v5 = vmax.f32 %v3477_v22, 0.0  ;;  %v1056_v6 = vmax.f32 %v3479_v23, 0.0 }
  0xfb   : > { %v3481_v24 = vpop.f32.mrf.mxu0  ;;  %v3483_v25 = vpop.f32.mrf.mxu1 }
  0xfc   : > { %v1055_v3 = vmax.f32 %v3481_v24, 0.0  ;;  %v1057_v4 = vmax.f32 %v3483_v25, 0.0 }
  0xfd   : > { %v366_v26 = vpop.f32.mrf.mxu0  ;;  %v461_v27 = vpop.f32.mrf.mxu1 }
  0xfe   : > { %v1070_v62 = vmax.f32 %v366_v26, 0.0  ;;  %v1072_v63 = vmax.f32 %v461_v27, 0.0 }
  0xff   : > { %v368_v28 = vpop.f32.mrf.mxu0  ;;  %v463_v29 = vpop.f32.mrf.mxu1 }
 0x100   : > { %v1071_v60 = vmax.f32 %v368_v28, 0.0  ;;  %v1073_v61 = vmax.f32 %v463_v29, 0.0  ;;  %v3553_v28 = vld [vmem:[%s3887_s2 + $0x18] sm:$0xff] }
 0x101   : > { %v372_v30 = vpop.f32.mrf.mxu0  ;;  %v467_v31 = vpop.f32.mrf.mxu1 }
 0x102   : > { %v1086_v56 = vmax.f32 %v372_v30, 0.0  ;;  %v1088_v57 = vmax.f32 %v467_v31, 0.0 }
 0x103   : > { %v374_v32 = vpop.f32.mrf.mxu0  ;;  %v469_v33 = vpop.f32.mrf.mxu1 }
 0x104   : > { %v1087_v54 = vmax.f32 %v374_v32, 0.0  ;;  %v1089_v55 = vmax.f32 %v469_v33, 0.0 }
 0x105   : > { %v378_v34 = vpop.f32.mrf.mxu0  ;;  %v473_v35 = vpop.f32.mrf.mxu1 }
 0x106   : > { %v1102_v50 = vmax.f32 %v378_v34, 0.0  ;;  %v1104_v51 = vmax.f32 %v473_v35, 0.0 }
 0x107   : > { %v380_v36 = vpop.f32.mrf.mxu0  ;;  %v475_v37 = vpop.f32.mrf.mxu1 }
 0x108   : > { %v1103_v48 = vmax.f32 %v380_v36, 0.0  ;;  %v1105_v49 = vmax.f32 %v475_v37, 0.0 }
 0x109   : > { %v384_v38 = vpop.f32.mrf.mxu0  ;;  %v479_v39 = vpop.f32.mrf.mxu1 }
 0x10a   : > { %v1118_v44 = vmax.f32 %v384_v38, 0.0  ;;  %v1120_v45 = vmax.f32 %v479_v39, 0.0 }
 0x10b   : > { %v386_v40 = vpop.f32.mrf.mxu0  ;;  %v481_v41 = vpop.f32.mrf.mxu1 }
 0x10c   : > { %v1119_v42 = vmax.f32 %v386_v40, 0.0  ;;  %v1121_v43 = vmax.f32 %v481_v41, 0.0 }
 0x10d   : > { %v3485_v46 = vpop.f32.mrf.mxu0  ;;  %v3487_v47 = vpop.f32.mrf.mxu1 }
 0x10e   : > { %2932 = vmatprep.subr.msk.mxu0 %vm1155_vm2, %v1119_v42  ;;  %2939 = vmatprep.subr.msk.mxu1 %vm1155_vm2, %v1121_v43  ;;  %v3580_v43 = vld [vmem:[%s3887_s2 + $0x20] sm:$0x1] }
 0x10f   : > { %v3491_v52 = vpop.f32.mrf.mxu0  ;;  %v3493_v53 = vpop.f32.mrf.mxu1  ;;  %2933 = vmatpush1.msk.msra.mxu0 %vm1155_vm2, %v1118_v44  ;;  %2940 = vmatpush1.msk.msra.mxu1 %vm1155_vm2, %v1120_v45 }
 0x110   : > { %1228 = vmatprep.subr.mxu0 %v1103_v48  ;;  %1323 = vmatprep.subr.mxu1 %v1105_v49 }
 0x111   : > { %v3497_v58 = vpop.f32.mrf.mxu0  ;;  %v3499_v59 = vpop.f32.mrf.mxu1  ;;  %1229 = vmatpush1.msra.mxu0 %v1102_v50  ;;  %1324 = vmatpush1.msra.mxu1 %v1104_v51 }
 0x112   : > { %1230 = vmatprep.subr.mxu0 %v1087_v54  ;;  %1325 = vmatprep.subr.mxu1 %v1089_v55  ;;  %v1074_v50 = vmax.f32 %v3497_v58, 0.0  ;;  %v1076_v51 = vmax.f32 %v3499_v59, 0.0  ;;  %v1059_v54 = vmax.f32 %v3491_v52, 0.0  ;;  %v1061_v55 = vmax.f32 %v3493_v53, 0.0 }
 0x113   : > { %v3501_v1 = vpop.f32.mrf.mxu0  ;;  %v3503_v2 = vpop.f32.mrf.mxu1  ;;  %1231 = vmatpush1.msra.mxu0 %v1086_v56  ;;  %1326 = vmatpush1.msra.mxu1 %v1088_v57  ;;  %v1060_v58 = vmax.f32 %v3487_v47, 0.0 }
 0x114   : > { %1232 = vmatprep.subr.mxu0 %v1071_v60  ;;  %1327 = vmatprep.subr.mxu1 %v1073_v61  ;;  %v1075_v44 = vmax.f32 %v3501_v1, 0.0  ;;  %v1077_v45 = vmax.f32 %v3503_v2, 0.0  ;;  %v1058_v60 = vmax.f32 %v3485_v46, 0.0 }
 0x115   : > { %v3509_v7 = vpop.f32.mrf.mxu0  ;;  %v3511_v8 = vpop.f32.mrf.mxu1  ;;  %1233 = vmatpush1.msra.mxu0 %v1070_v62  ;;  %1328 = vmatpush1.msra.mxu1 %v1072_v63 }
 0x116   : > { %1234 = vmatprep.subr.mxu0 %v1055_v3  ;;  %1329 = vmatprep.subr.mxu1 %v1057_v4  ;;  %v1090_v39 = vmax.f32 %v3509_v7, 0.0  ;;  %v1092_v40 = vmax.f32 %v3511_v8, 0.0 }
 0x117   : > { %v564_v10 = vpop.f32.mrf.mxu0  ;;  %v659_v11 = vpop.f32.mrf.mxu1  ;;  %1235 = vmatpush1.msra.mxu0 %v1054_v5  ;;  %1330 = vmatpush1.msra.mxu1 %v1056_v6 }
 0x118   : > { %2934 = vmatmul.mubr.msk.f32.vlgmr.msra.gmra.mxu0 %vm1139_vm3, %v3516_v9  ;;  %2941 = vmatmul.mubr.msk.f32.vlgmr.msra.gmra.mxu1 %vm1139_vm3, %v3516_v9  ;;  %v1091_v35 = vmax.f32 %v564_v10, 0.0  ;;  %v1093_v36 = vmax.f32 %v659_v11, 0.0 }
 0x119   : > { %v568_v12 = vpop.f32.mrf.mxu0  ;;  %v663_v13 = vpop.f32.mrf.mxu1  ;;  %1274 = vmatprep.mubr.f32.mxu0 %v3170_v0  ;;  %1369 = vmatprep.mubr.f32.mxu1 %v3170_v0 }
 0x11a   : > { %v1106_v33 = vmax.f32 %v568_v12, 0.0  ;;  %v1108_v34 = vmax.f32 %v663_v13, 0.0 }
 0x11b   : > { %v570_v15 = vpop.f32.mrf.mxu0  ;;  %v665_v16 = vpop.f32.mrf.mxu1 }
 0x11c   : > { %2935 = vmatmul.mubr.msk.f32.gmra.mxu0 %vm1139_vm3, %v3527_v14  ;;  %2942 = vmatmul.mubr.msk.f32.gmra.mxu1 %vm1139_vm3, %v3527_v14  ;;  %v1107_v29 = vmax.f32 %v570_v15, 0.0  ;;  %v1109_v30 = vmax.f32 %v665_v16, 0.0 }
 0x11d   : > { %v574_v17 = vpop.f32.mrf.mxu0  ;;  %v669_v18 = vpop.f32.mrf.mxu1  ;;  %1280 = vmatprep.mubr.f32.mxu0 %v3170_v0  ;;  %1375 = vmatprep.mubr.f32.mxu1 %v3170_v0 }
 0x11e   : > { %v1122_v24 = vmax.f32 %v574_v17, 0.0  ;;  %v1124_v25 = vmax.f32 %v669_v18, 0.0 }
 0x11f   : > { %v576_v20 = vpop.f32.mrf.mxu0  ;;  %v671_v21 = vpop.f32.mrf.mxu1 }
 0x120   : > { %v1123_v22 = vmax.f32 %v576_v20, 0.0  ;;  %v1125_v23 = vmax.f32 %v671_v21, 0.0  ;;  %2936 = vmatmul.mubr.msk.f32.gmra.mxu0 %vm1139_vm3, %v3538_v19  ;;  %2943 = vmatmul.mubr.msk.f32.gmra.mxu1 %vm1139_vm3, %v3538_v19 }
 0x121   : > { %v3544_v26 = vpop.f32.mrf.mxu0  ;;  %v3546_v27 = vpop.f32.mrf.mxu1  ;;  %1286 = vmatprep.mubr.f32.mxu0 %v3170_v0  ;;  %1381 = vmatprep.mubr.f32.mxu1 %v3170_v0 }
 0x122   : > { %2946 = vmatprep.subr.msk.mxu0 %vm1155_vm2, %v1123_v22  ;;  %2953 = vmatprep.subr.msk.mxu1 %vm1155_vm2, %v1125_v23 }
 0x123   : > { %v3557_v31 = vpop.f32.mrf.mxu0  ;;  %v3559_v32 = vpop.f32.mrf.mxu1  ;;  %2947 = vmatpush1.msk.msra.mxu0 %vm1155_vm2, %v1122_v24  ;;  %2954 = vmatpush1.msk.msra.mxu1 %vm1155_vm2, %v1124_v25 }
 0x124   : > { %2937 = vmatmul.mubr.msk.f32.gmra.mxu0 %vm1139_vm3, %v3553_v28  ;;  %2944 = vmatmul.mubr.msk.f32.gmra.mxu1 %vm1139_vm3, %v3553_v28 }
 0x125   : > { %1418 = vmatprep.subr.mxu0 %v1107_v29  ;;  %1513 = vmatprep.subr.mxu1 %v1109_v30  ;;  %v3567_v37 = vpop.f32.mrf.mxu0  ;;  %v3569_v38 = vpop.f32.mrf.mxu1 }
 0x126   : > { %1419 = vmatpush1.msra.mxu0 %v1106_v33  ;;  %1514 = vmatpush1.msra.mxu1 %v1108_v34 }
 0x127   : > { %1420 = vmatprep.subr.mxu0 %v1091_v35  ;;  %1515 = vmatprep.subr.mxu1 %v1093_v36  ;;  %v3573_v41 = vpop.f32.mrf.mxu0  ;;  %v3575_v42 = vpop.f32.mrf.mxu1  ;;  %v1078_v35 = vmax.f32 %v3567_v37, 0.0  ;;  %v1080_v36 = vmax.f32 %v3569_v38, 0.0  ;;  %v1064_v37 = vmax.f32 %v3546_v27, 0.0 }
 0x128   : > { %1292 = vmatprep.mubr.f32.mxu0 %v3170_v0  ;;  %1387 = vmatprep.mubr.f32.mxu1 %v3170_v0  ;;  %v1079_v29 = vmax.f32 %v3573_v41, 0.0  ;;  %v1081_v30 = vmax.f32 %v3575_v42, 0.0 }
 0x129   : > { %1421 = vmatpush1.msra.mxu0 %v1090_v39  ;;  %1516 = vmatpush1.msra.mxu1 %v1092_v40  ;;  %v3586_v48 = vpop.f32.mrf.mxu0  ;;  %v3588_v49 = vpop.f32.mrf.mxu1  ;;  %v1063_v39 = vmax.f32 %v3557_v31, 0.0  ;;  %v1065_v40 = vmax.f32 %v3559_v32, 0.0 }
 0x12a   : > { %2938 = vmatmul.mubr.msk.f32.gmra.mxu0 %vm1139_vm3, %v3580_v43  ;;  %2945 = vmatmul.mubr.msk.f32.gmra.mxu1 %vm1139_vm3, %v3580_v43  ;;  %v1094_v22 = vmax.f32 %v3586_v48, 0.0  ;;  %v1096_v23 = vmax.f32 %v3588_v49, 0.0 }
 0x12b   : > { %1422 = vmatprep.subr.mxu0 %v1075_v44  ;;  %1517 = vmatprep.subr.mxu1 %v1077_v45  ;;  %v754_v56 = vpop.f32.mrf.mxu0  ;;  %v849_v57 = vpop.f32.mrf.mxu1  ;;  %v1062_v44 = vmax.f32 %v3544_v26, 0.0 }
 0x12c   : > { %1423 = vmatpush1.msra.mxu0 %v1074_v50  ;;  %1518 = vmatpush1.msra.mxu1 %v1076_v51  ;;  %v1095_v17 = vmax.f32 %v754_v56, 0.0  ;;  %v1097_v18 = vmax.f32 %v849_v57, 0.0 }
 0x12d   : > { %1424 = vmatprep.subr.mxu0 %v1059_v54  ;;  %1519 = vmatprep.subr.mxu1 %v1061_v55  ;;  %v758_v59 = vpop.f32.mrf.mxu0  ;;  %v853_v61 = vpop.f32.mrf.mxu1 }
 0x12e   : > { %1425 = vmatpush1.msra.mxu0 %v1058_v60  ;;  %1458 = vmatprep.mubr.f32.mxu0 %v3170_v0  ;;  %v1110_v12 = vmax.f32 %v758_v59, 0.0  ;;  %v1112_v13 = vmax.f32 %v853_v61, 0.0 }
 0x12f   : > { %1520 = vmatpush1.msra.mxu1 %v1060_v58  ;;  %1553 = vmatprep.mubr.f32.mxu1 %v3170_v0  ;;  %v760_v52 = vpop.f32.mrf.mxu0  ;;  %v855_v53 = vpop.f32.mrf.mxu1 }
 0x130   : > { %2948 = vmatmul.mubr.msk.f32.vlgmr.msra.gmra.mxu0 %vm1139_vm3, %v3516_v9  ;;  %2955 = vmatmul.mubr.msk.f32.vlgmr.msra.gmra.mxu1 %vm1139_vm3, %v3516_v9  ;;  %v1111_v10 = vmax.f32 %v760_v52, 0.0  ;;  %v1113_v11 = vmax.f32 %v855_v53, 0.0 }
 0x131   : > { %1464 = vmatprep.mubr.f32.mxu0 %v3170_v0  ;;  %1559 = vmatprep.mubr.f32.mxu1 %v3170_v0  ;;  %v764_v46 = vpop.f32.mrf.mxu0  ;;  %v859_v47 = vpop.f32.mrf.mxu1 }
 0x132   : > { %v1126_v3 = vmax.f32 %v764_v46, 0.0  ;;  %v1128_v4 = vmax.f32 %v859_v47, 0.0 }
 0x133   : > { %v766_v62 = vpop.f32.mrf.mxu0  ;;  %v861_v63 = vpop.f32.mrf.mxu1 }
 0x134   : > { %2949 = vmatmul.mubr.msk.f32.gmra.mxu0 %vm1139_vm3, %v3527_v14  ;;  %2956 = vmatmul.mubr.msk.f32.gmra.mxu1 %vm1139_vm3, %v3527_v14  ;;  %v1127_v1 = vmax.f32 %v766_v62, 0.0  ;;  %v1129_v2 = vmax.f32 %v861_v63, 0.0 }
 0x135   : > { %1470 = vmatprep.mubr.f32.mxu0 %v3170_v0  ;;  %1565 = vmatprep.mubr.f32.mxu1 %v3170_v0  ;;  %v3614_v5 = vpop.f32.mrf.mxu0  ;;  %v3616_v6 = vpop.f32.mrf.mxu1 }
 0x136   : > { %2960 = vmatprep.subr.msk.mxu0 %vm1155_vm2, %v1127_v1  ;;  %2967 = vmatprep.subr.msk.mxu1 %vm1155_vm2, %v1129_v2  ;;  %v1066_v1 = vmax.f32 %v3614_v5, 0.0  ;;  %v1068_v2 = vmax.f32 %v3616_v6, 0.0 }
 0x137   : > { %v3620_v7 = vpop.f32.mrf.mxu0  ;;  %v3622_v8 = vpop.f32.mrf.mxu1  ;;  %2961 = vmatpush1.msk.msra.mxu0 %vm1155_vm2, %v1126_v3  ;;  %2968 = vmatpush1.msk.msra.mxu1 %vm1155_vm2, %v1128_v4 }
 0x138   : > { %2950 = vmatmul.mubr.msk.f32.gmra.mxu0 %vm1139_vm3, %v3538_v19  ;;  %2957 = vmatmul.mubr.msk.f32.gmra.mxu1 %vm1139_vm3, %v3538_v19  ;;  %v1067_v62 = vmax.f32 %v3620_v7, 0.0  ;;  %v1069_v63 = vmax.f32 %v3622_v8, 0.0 }
 0x139   : > { %1476 = vmatprep.mubr.f32.mxu0 %v3170_v0  ;;  %1571 = vmatprep.mubr.f32.mxu1 %v3170_v0  ;;  %v3632_v15 = vpop.f32.mrf.mxu0  ;;  %v3634_v16 = vpop.f32.mrf.mxu1 }
 0x13a   : > { %1608 = vmatprep.subr.mxu0 %v1111_v10  ;;  %1703 = vmatprep.subr.mxu1 %v1113_v11  ;;  %v1082_v46 = vmax.f32 %v3632_v15, 0.0  ;;  %v1084_v47 = vmax.f32 %v3634_v16, 0.0 }
 0x13b   : > { %1609 = vmatpush1.msra.mxu0 %v1110_v12  ;;  %1704 = vmatpush1.msra.mxu1 %v1112_v13  ;;  %v3636_v20 = vpop.f32.mrf.mxu0  ;;  %v3638_v21 = vpop.f32.mrf.mxu1 }
 0x13c   : > { %2951 = vmatmul.mubr.msk.f32.gmra.mxu0 %vm1139_vm3, %v3553_v28  ;;  %2958 = vmatmul.mubr.msk.f32.gmra.mxu1 %vm1139_vm3, %v3553_v28  ;;  %v1083_v52 = vmax.f32 %v3636_v20, 0.0  ;;  %v1085_v53 = vmax.f32 %v3638_v21, 0.0 }
 0x13d   : > { %1610 = vmatprep.subr.mxu0 %v1095_v17  ;;  %1705 = vmatprep.subr.mxu1 %v1097_v18  ;;  %v3646_v24 = vpop.f32.mrf.mxu0  ;;  %v3648_v25 = vpop.f32.mrf.mxu1 }
 0x13e   : > { %1482 = vmatprep.mubr.f32.mxu0 %v3170_v0  ;;  %1577 = vmatprep.mubr.f32.mxu1 %v3170_v0  ;;  %v1098_v59 = vmax.f32 %v3646_v24, 0.0  ;;  %v1100_v61 = vmax.f32 %v3648_v25, 0.0 }
 0x13f   : > { %1611 = vmatpush1.msra.mxu0 %v1094_v22  ;;  %1706 = vmatpush1.msra.mxu1 %v1096_v23  ;;  %v944_v33 = vpop.f32.mrf.mxu0  ;;  %v1039_v34 = vpop.f32.mrf.mxu1 }
 0x140   : > { %2952 = vmatmul.mubr.msk.f32.gmra.mxu0 %vm1139_vm3, %v3580_v43  ;;  %2959 = vmatmul.mubr.msk.f32.gmra.mxu1 %vm1139_vm3, %v3580_v43  ;;  %v1099_v60 = vmax.f32 %v944_v33, 0.0  ;;  %v1101_v58 = vmax.f32 %v1039_v34, 0.0 }
 0x141   : > { %1612 = vmatprep.subr.mxu0 %v1079_v29  ;;  %1707 = vmatprep.subr.mxu1 %v1081_v30  ;;  %v948_v41 = vpop.f32.mrf.mxu0  ;;  %v1043_v42 = vpop.f32.mrf.mxu1 }
 0x142   : > { %1613 = vmatpush1.msra.mxu0 %v1078_v35  ;;  %1708 = vmatpush1.msra.mxu1 %v1080_v36  ;;  %v1114_v56 = vmax.f32 %v948_v41, 0.0  ;;  %v1116_v57 = vmax.f32 %v1043_v42, 0.0 }
 0x143   : > { %1614 = vmatprep.subr.mxu0 %v1063_v39  ;;  %1709 = vmatprep.subr.mxu1 %v1065_v40  ;;  %v950_v38 = vpop.f32.mrf.mxu0  ;;  %v1045_v45 = vpop.f32.mrf.mxu1 }
 0x144   : > { %1615 = vmatpush1.msra.mxu0 %v1062_v44  ;;  %1648 = vmatprep.mubr.f32.mxu0 %v3170_v0  ;;  %v1115_v54 = vmax.f32 %v950_v38, 0.0  ;;  %v1117_v55 = vmax.f32 %v1045_v45, 0.0 }
 0x145   : > { %1710 = vmatpush1.msra.mxu1 %v1064_v37  ;;  %1743 = vmatprep.mubr.f32.mxu1 %v3170_v0  ;;  %v954_v31 = vpop.f32.mrf.mxu0  ;;  %v1049_v32 = vpop.f32.mrf.mxu1 }
 0x146   : > { %2962 = vmatmul.mubr.msk.f32.vlgmr.msra.gmra.mxu0 %vm1139_vm3, %v3516_v9  ;;  %2969 = vmatmul.mubr.msk.f32.vlgmr.msra.gmra.mxu1 %vm1139_vm3, %v3516_v9  ;;  %v1130_v50 = vmax.f32 %v954_v31, 0.0  ;;  %v1132_v51 = vmax.f32 %v1049_v32, 0.0 }
 0x147   : > { %1654 = vmatprep.mubr.f32.mxu0 %v3170_v0  ;;  %1749 = vmatprep.mubr.f32.mxu1 %v3170_v0  ;;  %v956_v26 = vpop.f32.mrf.mxu0  ;;  %v1051_v27 = vpop.f32.mrf.mxu1 }
 0x148   : > { %v1131_v48 = vmax.f32 %v956_v26, 0.0  ;;  %v1133_v49 = vmax.f32 %v1051_v27, 0.0 }
 0x14a   : > { %2963 = vmatmul.mubr.msk.f32.gmra.mxu0 %vm1139_vm3, %v3527_v14  ;;  %2970 = vmatmul.mubr.msk.f32.gmra.mxu1 %vm1139_vm3, %v3527_v14 }
 0x14b   : > { %1660 = vmatprep.mubr.f32.mxu0 %v3170_v0  ;;  %1755 = vmatprep.mubr.f32.mxu1 %v3170_v0 }
 0x14c   : > { %2974 = vmatprep.subr.msk.mxu0 %vm1155_vm2, %v1131_v48  ;;  %2981 = vmatprep.subr.msk.mxu1 %vm1155_vm2, %v1133_v49 }
 0x14d   : > { %2975 = vmatpush1.msk.msra.mxu0 %vm1155_vm2, %v1130_v50  ;;  %2982 = vmatpush1.msk.msra.mxu1 %vm1155_vm2, %v1132_v51 }
 0x14e   : > { %2964 = vmatmul.mubr.msk.f32.gmra.mxu0 %vm1139_vm3, %v3538_v19  ;;  %2971 = vmatmul.mubr.msk.f32.gmra.mxu1 %vm1139_vm3, %v3538_v19 }
 0x14f   : > { %1666 = vmatprep.mubr.f32.mxu0 %v3170_v0  ;;  %1761 = vmatprep.mubr.f32.mxu1 %v3170_v0 }
 0x150   : > { %1798 = vmatprep.subr.mxu0 %v1115_v54  ;;  %1893 = vmatprep.subr.mxu1 %v1117_v55  ;;  %v3771_v55 = vld [vmem:[%s3888_s3] sm:$0x1] }
 0x151   : > { %1799 = vmatpush1.msra.mxu0 %v1114_v56  ;;  %1894 = vmatpush1.msra.mxu1 %v1116_v57 }
 0x152   : > { %2965 = vmatmul.mubr.msk.f32.gmra.mxu0 %vm1139_vm3, %v3553_v28  ;;  %2972 = vmatmul.mubr.msk.f32.gmra.mxu1 %vm1139_vm3, %v3553_v28 }
 0x153   : > { %1800 = vmatprep.subr.mxu0 %v1099_v60  ;;  %1895 = vmatprep.subr.mxu1 %v1101_v58 }
 0x154   : > { %1672 = vmatprep.mubr.f32.mxu0 %v3170_v0  ;;  %1767 = vmatprep.mubr.f32.mxu1 %v3170_v0 }
 0x155   : > { %1801 = vmatpush1.msra.mxu0 %v1098_v59  ;;  %1896 = vmatpush1.msra.mxu1 %v1100_v61 }
 0x156   : > { %2966 = vmatmul.mubr.msk.f32.gmra.mxu0 %vm1139_vm3, %v3580_v43  ;;  %2973 = vmatmul.mubr.msk.f32.gmra.mxu1 %vm1139_vm3, %v3580_v43 }
 0x157   : > { %1802 = vmatprep.subr.mxu0 %v1083_v52  ;;  %1897 = vmatprep.subr.mxu1 %v1085_v53 }
 0x158   : > { %1803 = vmatpush1.msra.mxu0 %v1082_v46  ;;  %1898 = vmatpush1.msra.mxu1 %v1084_v47 }
 0x159   : > { %1804 = vmatprep.subr.mxu0 %v1067_v62  ;;  %1899 = vmatprep.subr.mxu1 %v1069_v63 }
 0x15a   : > { %1805 = vmatpush1.msra.mxu0 %v1066_v1  ;;  %1838 = vmatprep.mubr.f32.mxu0 %v3170_v0 }
 0x15b   : > { %1900 = vmatpush1.msra.mxu1 %v1068_v2  ;;  %1933 = vmatprep.mubr.f32.mxu1 %v3170_v0 }
 0x15c   : > { %2976 = vmatmul.mubr.msk.f32.vlgmr.msra.gmra.mxu0 %vm1139_vm3, %v3516_v9  ;;  %2983 = vmatmul.mubr.msk.f32.vlgmr.msra.gmra.mxu1 %vm1139_vm3, %v3516_v9 }
 0x15d   : > { %1844 = vmatprep.mubr.f32.mxu0 %v3170_v0  ;;  %1939 = vmatprep.mubr.f32.mxu1 %v3170_v0 }
 0x160   : > { %2977 = vmatmul.mubr.msk.f32.gmra.mxu0 %vm1139_vm3, %v3527_v14  ;;  %2984 = vmatmul.mubr.msk.f32.gmra.mxu1 %vm1139_vm3, %v3527_v14 }
 0x161   : > { %1850 = vmatprep.mubr.f32.mxu0 %v3170_v0  ;;  %1945 = vmatprep.mubr.f32.mxu1 %v3170_v0 }
 0x164   : > { %2978 = vmatmul.mubr.msk.f32.gmra.mxu0 %vm1139_vm3, %v3538_v19  ;;  %2985 = vmatmul.mubr.msk.f32.gmra.mxu1 %vm1139_vm3, %v3538_v19 }
 0x165   : > { %1856 = vmatprep.mubr.f32.mxu0 %v3170_v0  ;;  %1951 = vmatprep.mubr.f32.mxu1 %v3170_v0 }
 0x168   : > { %2979 = vmatmul.mubr.msk.f32.gmra.mxu0 %vm1139_vm3, %v3553_v28  ;;  %2986 = vmatmul.mubr.msk.f32.gmra.mxu1 %vm1139_vm3, %v3553_v28 }
 0x169   : > { %1862 = vmatprep.mubr.f32.mxu0 %v3170_v0  ;;  %1957 = vmatprep.mubr.f32.mxu1 %v3170_v0 }
 0x16c   : > { %2980 = vmatmul.mubr.msk.f32.gmra.mxu0 %vm1139_vm3, %v3580_v43  ;;  %2987 = vmatmul.mubr.msk.f32.gmra.mxu1 %vm1139_vm3, %v3580_v43 }
 0x16d   : > { %2160 = vmatprep.mubr.f32.mxu0 %v3170_v0  ;;  %2231 = vmatprep.mubr.f32.mxu1 %v3170_v0 }
 0x1d8   : > { %v3740_v9 = vpop.f32.mrf.mxu0  ;;  %v3742_v14 = vpop.f32.mrf.mxu1 }
 0x1d9   : > { %v1964_v49 = vmax.f32 %v3740_v9, 0.0  ;;  %v1966_v50 = vmax.f32 %v3742_v14, 0.0 }
 0x1da   : > { %v3744_v19 = vpop.f32.mrf.mxu0  ;;  %v3746_v28 = vpop.f32.mrf.mxu1 }
 0x1db   : > { %v1965_v27 = vmax.f32 %v3744_v19, 0.0  ;;  %v1967_v48 = vmax.f32 %v3746_v28, 0.0 }
 0x1dc   : > { %v1276_v3 = vpop.f32.mrf.mxu0  ;;  %v1371_v4 = vpop.f32.mrf.mxu1 }
 0x1dd   : > { %v1980_v45 = vmax.f32 %v1276_v3, 0.0  ;;  %v1982_v31 = vmax.f32 %v1371_v4, 0.0 }
 0x1de   : > { %v1278_v5 = vpop.f32.mrf.mxu0  ;;  %v1373_v6 = vpop.f32.mrf.mxu1 }
 0x1df   : > { %v1981_v37 = vmax.f32 %v1278_v5, 0.0  ;;  %v1983_v38 = vmax.f32 %v1373_v6, 0.0 }
 0x1e0   : > { %v1282_v7 = vpop.f32.mrf.mxu0  ;;  %v1377_v8 = vpop.f32.mrf.mxu1 }
 0x1e1   : > { %v1996_v40 = vmax.f32 %v1282_v7, 0.0  ;;  %v1998_v41 = vmax.f32 %v1377_v8, 0.0 }
 0x1e2   : > { %v1284_v10 = vpop.f32.mrf.mxu0  ;;  %v1379_v43 = vpop.f32.mrf.mxu1 }
 0x1e3   : > { %v1997_v36 = vmax.f32 %v1284_v10, 0.0  ;;  %v1999_v39 = vmax.f32 %v1379_v43, 0.0 }
 0x1e4   : > { %v1288_v11 = vpop.f32.mrf.mxu0  ;;  %v1383_v12 = vpop.f32.mrf.mxu1 }
 0x1e5   : > { %v2012_v30 = vmax.f32 %v1288_v11, 0.0  ;;  %v2014_v33 = vmax.f32 %v1383_v12, 0.0 }
 0x1e6   : > { %v1290_v13 = vpop.f32.mrf.mxu0  ;;  %v1385_v15 = vpop.f32.mrf.mxu1 }
 0x1e7   : > { %v2013_v25 = vmax.f32 %v1290_v13, 0.0  ;;  %v2015_v29 = vmax.f32 %v1385_v15, 0.0 }
 0x1ea   : > { %v1294_v16 = vpop.f32.mrf.mxu0  ;;  %v1389_v17 = vpop.f32.mrf.mxu1 }
 0x1eb   : > { %v2028_v23 = vmax.f32 %v1294_v16, 0.0  ;;  %v2030_v24 = vmax.f32 %v1389_v17, 0.0 }
 0x1ec   : > { %v1296_v18 = vpop.f32.mrf.mxu0  ;;  %v1391_v20 = vpop.f32.mrf.mxu1 }
 0x1ed   : > { %v2029_v21 = vmax.f32 %v1296_v18, 0.0  ;;  %v2031_v22 = vmax.f32 %v1391_v20, 0.0 }
 0x1ef   : > { %2988 = vmatprep.subr.msk.mxu0 %vm1155_vm2, %v2029_v21  ;;  %2991 = vmatprep.subr.msk.mxu1 %vm1155_vm2, %v2031_v22 }
 0x1f0   : > { %v3750_v34 = vpop.f32.mrf.mxu0  ;;  %v3752_v35 = vpop.f32.mrf.mxu1  ;;  %2989 = vmatpush1.msk.msra.mxu0 %vm1155_vm2, %v2028_v23  ;;  %2992 = vmatpush1.msk.msra.mxu1 %vm1155_vm2, %v2030_v24 }
 0x1f1   : > { %2120 = vmatprep.subr.mxu0 %v2013_v25  ;;  %2191 = vmatprep.subr.mxu1 %v2015_v29  ;;  %v1968_v23 = vmax.f32 %v3750_v34, 0.0  ;;  %v1970_v24 = vmax.f32 %v3752_v35, 0.0 }
 0x1f2   : > { %v3756_v42 = vpop.f32.mrf.mxu0  ;;  %v3758_v44 = vpop.f32.mrf.mxu1  ;;  %2121 = vmatpush1.msra.mxu0 %v2012_v30  ;;  %2192 = vmatpush1.msra.mxu1 %v2014_v33 }
 0x1f3   : > { %2122 = vmatprep.subr.mxu0 %v1997_v36  ;;  %2193 = vmatprep.subr.mxu1 %v1999_v39  ;;  %v1969_v21 = vmax.f32 %v3756_v42, 0.0  ;;  %v1971_v22 = vmax.f32 %v3758_v44, 0.0 }
 0x1f4   : > { %v3760_v32 = vpop.f32.mrf.mxu0  ;;  %v3762_v26 = vpop.f32.mrf.mxu1  ;;  %2123 = vmatpush1.msra.mxu0 %v1996_v40  ;;  %2194 = vmatpush1.msra.mxu1 %v1998_v41 }
 0x1f5   : > { %2124 = vmatprep.subr.mxu0 %v1981_v37  ;;  %2195 = vmatprep.subr.mxu1 %v1983_v38  ;;  %v1984_v16 = vmax.f32 %v3760_v32, 0.0  ;;  %v1986_v17 = vmax.f32 %v3762_v26, 0.0 }
 0x1f6   : > { %v1468_v51 = vpop.f32.mrf.mxu0  ;;  %v1563_v54 = vpop.f32.mrf.mxu1  ;;  %2125 = vmatpush1.msra.mxu0 %v1980_v45  ;;  %2196 = vmatpush1.msra.mxu1 %v1982_v31 }
 0x1f7   : > { %2126 = vmatprep.subr.mxu0 %v1965_v27  ;;  %2197 = vmatprep.subr.mxu1 %v1967_v48  ;;  %v1985_v13 = vmax.f32 %v1468_v51, 0.0  ;;  %v1987_v15 = vmax.f32 %v1563_v54, 0.0 }
 0x1f8   : > { %v1472_v56 = vpop.f32.mrf.mxu0  ;;  %v1567_v57 = vpop.f32.mrf.mxu1  ;;  %2127 = vmatpush1.msra.mxu0 %v1964_v49  ;;  %2198 = vmatpush1.msra.mxu1 %v1966_v50 }
 0x1f9   : > { %2990 = vmatmul.mubr.msk.f32.vlgmr.msra.gmra.mxu0 %vm1139_vm3, %v3771_v55  ;;  %2993 = vmatmul.mubr.msk.f32.vlgmr.msra.gmra.mxu1 %vm1139_vm3, %v3771_v55  ;;  %v2000_v10 = vmax.f32 %v1472_v56, 0.0  ;;  %v2002_v43 = vmax.f32 %v1567_v57, 0.0 }
 0x1fa   : > { %v1474_v60 = vpop.f32.mrf.mxu0  ;;  %v1569_v58 = vpop.f32.mrf.mxu1  ;;  %2302 = vmatprep.mubr.f32.mxu0 %v3170_v0  ;;  %2373 = vmatprep.mubr.f32.mxu1 %v3170_v0 }
 0x1fb   : > { %v2001_v7 = vmax.f32 %v1474_v60, 0.0  ;;  %v2003_v8 = vmax.f32 %v1569_v58, 0.0 }
 0x1fc   : > { %v1478_v59 = vpop.f32.mrf.mxu0  ;;  %v1573_v61 = vpop.f32.mrf.mxu1 }
 0x1fd   : > { %v2016_v3 = vmax.f32 %v1478_v59, 0.0  ;;  %v2018_v4 = vmax.f32 %v1573_v61, 0.0 }
 0x1fe   : > { %v1480_v52 = vpop.f32.mrf.mxu0  ;;  %v1575_v53 = vpop.f32.mrf.mxu1 }
 0x1ff   : > { %v2017_v19 = vmax.f32 %v1480_v52, 0.0  ;;  %v2019_v28 = vmax.f32 %v1575_v53, 0.0 }
 0x200   : > { %v1484_v46 = vpop.f32.mrf.mxu0  ;;  %v1579_v47 = vpop.f32.mrf.mxu1 }
 0x201   : > { %v2032_v9 = vmax.f32 %v1484_v46, 0.0  ;;  %v2034_v14 = vmax.f32 %v1579_v47, 0.0 }
 0x202   : > { %v1486_v62 = vpop.f32.mrf.mxu0  ;;  %v1581_v63 = vpop.f32.mrf.mxu1 }
 0x203   : > { %v2033_v1 = vmax.f32 %v1486_v62, 0.0  ;;  %v2035_v2 = vmax.f32 %v1581_v63, 0.0 }
 0x205   : > { %2994 = vmatprep.subr.msk.mxu0 %vm1155_vm2, %v2033_v1  ;;  %2997 = vmatprep.subr.msk.mxu1 %vm1155_vm2, %v2035_v2 }
 0x206   : > { %v3781_v5 = vpop.f32.mrf.mxu0  ;;  %v3783_v6 = vpop.f32.mrf.mxu1  ;;  %2995 = vmatpush1.msk.msra.mxu0 %vm1155_vm2, %v2032_v9  ;;  %2998 = vmatpush1.msk.msra.mxu1 %vm1155_vm2, %v2034_v14 }
 0x207   : > { %2262 = vmatprep.subr.mxu0 %v2017_v19  ;;  %2333 = vmatprep.subr.mxu1 %v2019_v28  ;;  %v1972_v9 = vmax.f32 %v3781_v5, 0.0  ;;  %v1974_v14 = vmax.f32 %v3783_v6, 0.0 }
 0x208   : > { %v3787_v11 = vpop.f32.mrf.mxu0  ;;  %v3789_v12 = vpop.f32.mrf.mxu1  ;;  %2263 = vmatpush1.msra.mxu0 %v2016_v3  ;;  %2334 = vmatpush1.msra.mxu1 %v2018_v4 }
 0x209   : > { %2264 = vmatprep.subr.mxu0 %v2001_v7  ;;  %2335 = vmatprep.subr.mxu1 %v2003_v8  ;;  %v1973_v1 = vmax.f32 %v3787_v11, 0.0  ;;  %v1975_v2 = vmax.f32 %v3789_v12, 0.0 }
 0x20a   : > { %v3793_v18 = vpop.f32.mrf.mxu0  ;;  %v3795_v20 = vpop.f32.mrf.mxu1  ;;  %2265 = vmatpush1.msra.mxu0 %v2000_v10  ;;  %2336 = vmatpush1.msra.mxu1 %v2002_v43 }
 0x20b   : > { %2266 = vmatprep.subr.mxu0 %v1985_v13  ;;  %2337 = vmatprep.subr.mxu1 %v1987_v15  ;;  %v1988_v46 = vmax.f32 %v3793_v18, 0.0  ;;  %v1990_v47 = vmax.f32 %v3795_v20, 0.0 }
 0x20c   : > { %v1658_v25 = vpop.f32.mrf.mxu0  ;;  %v1753_v29 = vpop.f32.mrf.mxu1  ;;  %2267 = vmatpush1.msra.mxu0 %v1984_v16  ;;  %2338 = vmatpush1.msra.mxu1 %v1986_v17 }
 0x20d   : > { %2268 = vmatprep.subr.mxu0 %v1969_v21  ;;  %2339 = vmatprep.subr.mxu1 %v1971_v22  ;;  %v1989_v52 = vmax.f32 %v1658_v25, 0.0  ;;  %v1991_v53 = vmax.f32 %v1753_v29, 0.0 }
 0x20e   : > { %v1662_v30 = vpop.f32.mrf.mxu0  ;;  %v1757_v33 = vpop.f32.mrf.mxu1  ;;  %2269 = vmatpush1.msra.mxu0 %v1968_v23  ;;  %2340 = vmatpush1.msra.mxu1 %v1970_v24 }
 0x20f   : > { %2996 = vmatmul.mubr.msk.f32.vlgmr.msra.gmra.mxu0 %vm1139_vm3, %v3771_v55  ;;  %2999 = vmatmul.mubr.msk.f32.vlgmr.msra.gmra.mxu1 %vm1139_vm3, %v3771_v55  ;;  %v2004_v60 = vmax.f32 %v1662_v30, 0.0  ;;  %v2006_v58 = vmax.f32 %v1757_v33, 0.0 }
 0x210   : > { %v1664_v36 = vpop.f32.mrf.mxu0  ;;  %v1759_v34 = vpop.f32.mrf.mxu1  ;;  %2444 = vmatprep.mubr.f32.mxu0 %v3170_v0  ;;  %2515 = vmatprep.mubr.f32.mxu1 %v3170_v0 }
 0x211   : > { %v2005_v56 = vmax.f32 %v1664_v36, 0.0  ;;  %v2007_v57 = vmax.f32 %v1759_v34, 0.0 }
 0x212   : > { %v1668_v35 = vpop.f32.mrf.mxu0  ;;  %v1763_v39 = vpop.f32.mrf.mxu1 }
 0x213   : > { %v2020_v49 = vmax.f32 %v1668_v35, 0.0  ;;  %v2022_v50 = vmax.f32 %v1763_v39, 0.0 }
 0x214   : > { %v1670_v40 = vpop.f32.mrf.mxu0  ;;  %v1765_v41 = vpop.f32.mrf.mxu1 }
 0x215   : > { %v2021_v27 = vmax.f32 %v1670_v40, 0.0  ;;  %v2023_v48 = vmax.f32 %v1765_v41, 0.0 }
 0x216   : > { %v1674_v42 = vpop.f32.mrf.mxu0  ;;  %v1769_v44 = vpop.f32.mrf.mxu1 }
 0x217   : > { %v2036_v32 = vmax.f32 %v1674_v42, 0.0  ;;  %v2038_v26 = vmax.f32 %v1769_v44, 0.0  ;;  %v3171_v44 = vmov 1966171168  }
 0x218   : > { %v1676_v37 = vpop.f32.mrf.mxu0  ;;  %v1771_v38 = vpop.f32.mrf.mxu1 }
 0x219   : > { %v2037_v45 = vmax.f32 %v1676_v37, 0.0  ;;  %v2039_v31 = vmax.f32 %v1771_v38, 0.0  ;;  %v2685_v37 = vunpack.c.l.s4 %v3171_v44  ;;  %v2687_v38 = vlaneseq }
 0x21b   : > { %3000 = vmatprep.subr.msk.mxu0 %vm1155_vm2, %v2037_v45  ;;  %3003 = vmatprep.subr.msk.mxu1 %vm1155_vm2, %v2039_v31 }
 0x21c   : > { %v3809_v51 = vpop.f32.mrf.mxu0  ;;  %v3811_v54 = vpop.f32.mrf.mxu1  ;;  %3001 = vmatpush1.msk.msra.mxu0 %vm1155_vm2, %v2036_v32  ;;  %3004 = vmatpush1.msk.msra.mxu1 %vm1155_vm2, %v2038_v26  ;;  %v2686_v32 = vunpack.c.0.s8 %v2685_v37  ;;  %v2688_v26 = vshrl.u32 %v2687_v38, 7 }
 0x21d   : > { %2404 = vmatprep.subr.mxu0 %v2021_v27  ;;  %2475 = vmatprep.subr.mxu1 %v2023_v48  ;;  %v1976_v41 = vmax.f32 %v3809_v51, 0.0  ;;  %v1978_v42 = vmax.f32 %v3811_v54, 0.0 }
 0x21e   : > { %v3815_v59 = vpop.f32.mrf.mxu0  ;;  %v3817_v61 = vpop.f32.mrf.mxu1  ;;  %2405 = vmatpush1.msra.mxu0 %v2020_v49  ;;  %2476 = vmatpush1.msra.mxu1 %v2022_v50  ;;  %v2689_v50 = vsub.s32 %v2686_v32, %v2688_v26 }
 0x21f   : > { %2406 = vmatprep.subr.mxu0 %v2005_v56  ;;  %2477 = vmatprep.subr.mxu1 %v2007_v57  ;;  %v1977_v39 = vmax.f32 %v3815_v59, 0.0  ;;  %v1979_v40 = vmax.f32 %v3817_v61, 0.0 }
 0x220   : > { %v3821_v62 = vpop.f32.mrf.mxu0  ;;  %v3823_v63 = vpop.f32.mrf.mxu1  ;;  %2407 = vmatpush1.msra.mxu0 %v2004_v60  ;;  %2478 = vmatpush1.msra.mxu1 %v2006_v58 }
 0x221   : > { %2408 = vmatprep.subr.mxu0 %v1989_v52  ;;  %2479 = vmatprep.subr.mxu1 %v1991_v53  ;;  %v1992_v34 = vmax.f32 %v3821_v62, 0.0  ;;  %v1994_v35 = vmax.f32 %v3823_v63, 0.0 }
 0x222   : > { %v1848_v19 = vpop.f32.mrf.mxu0  ;;  %v1943_v28 = vpop.f32.mrf.mxu1  ;;  %2409 = vmatpush1.msra.mxu0 %v1988_v46  ;;  %2480 = vmatpush1.msra.mxu1 %v1990_v47 }
 0x223   : > { %2410 = vmatprep.subr.mxu0 %v1973_v1  ;;  %2481 = vmatprep.subr.mxu1 %v1975_v2  ;;  %v1993_v33 = vmax.f32 %v1848_v19, 0.0  ;;  %v1995_v36 = vmax.f32 %v1943_v28, 0.0 }
 0x224   : > { %v1852_v3 = vpop.f32.mrf.mxu0  ;;  %v1947_v4 = vpop.f32.mrf.mxu1  ;;  %2411 = vmatpush1.msra.mxu0 %v1972_v9  ;;  %2482 = vmatpush1.msra.mxu1 %v1974_v14 }
 0x225   : > { %3002 = vmatmul.mubr.msk.f32.vlgmr.msra.gmra.mxu0 %vm1139_vm3, %v3771_v55  ;;  %3005 = vmatmul.mubr.msk.f32.vlgmr.msra.gmra.mxu1 %vm1139_vm3, %v3771_v55  ;;  %v2008_v29 = vmax.f32 %v1852_v3, 0.0  ;;  %v2010_v30 = vmax.f32 %v1947_v4, 0.0 }
 0x226   : > { %v1854_v7 = vpop.f32.mrf.mxu0  ;;  %v1949_v5 = vpop.f32.mrf.mxu1  ;;  %2586 = vmatprep.mubr.f32.mxu0 %v3170_v0  ;;  %2657 = vmatprep.mubr.f32.mxu1 %v3170_v0 }
 0x227   : > { %v2009_v24 = vmax.f32 %v1854_v7, 0.0  ;;  %v2011_v25 = vmax.f32 %v1949_v5, 0.0 }
 0x228   : > { %v1858_v6 = vpop.f32.mrf.mxu0  ;;  %v1953_v8 = vpop.f32.mrf.mxu1 }
 0x229   : > { %v2024_v23 = vmax.f32 %v1858_v6, 0.0  ;;  %v2026_v0 = vmax.f32 %v1953_v8, 0.0 }
 0x22a   : > { %v1860_v10 = vpop.f32.mrf.mxu0  ;;  %v1955_v43 = vpop.f32.mrf.mxu1 }
 0x22b   : > { %v2025_v21 = vmax.f32 %v1860_v10, 0.0  ;;  %v2027_v22 = vmax.f32 %v1955_v43, 0.0 }
 0x22c   : > { %v1864_v11 = vpop.f32.mrf.mxu0  ;;  %v1959_v12 = vpop.f32.mrf.mxu1 }
 0x22d   : > { %v2040_v18 = vmax.f32 %v1864_v11, 0.0  ;;  %v2042_v20 = vmax.f32 %v1959_v12, 0.0 }
 0x22e   : > { %v1866_v13 = vpop.f32.mrf.mxu0  ;;  %v1961_v15 = vpop.f32.mrf.mxu1 }
 0x22f   : > { %v2041_v16 = vmax.f32 %v1866_v13, 0.0  ;;  %v2043_v17 = vmax.f32 %v1961_v15, 0.0 }
 0x231   : > { %3006 = vmatprep.subr.msk.mxu0 %vm1155_vm2, %v2041_v16  ;;  %3009 = vmatprep.subr.msk.mxu1 %vm1155_vm2, %v2043_v17 }
 0x232   : > { %3007 = vmatpush1.msk.msra.mxu0 %vm1155_vm2, %v2040_v18  ;;  %3010 = vmatpush1.msk.msra.mxu1 %vm1155_vm2, %v2042_v20 }
 0x233   : > { %2546 = vmatprep.subr.mxu0 %v2025_v21  ;;  %2617 = vmatprep.subr.mxu1 %v2027_v22 }
 0x234   : > { %2547 = vmatpush1.msra.mxu0 %v2024_v23  ;;  %2618 = vmatpush1.msra.mxu1 %v2026_v0 }
 0x235   : > { %2548 = vmatprep.subr.mxu0 %v2009_v24  ;;  %2619 = vmatprep.subr.mxu1 %v2011_v25 }
 0x236   : > { %2549 = vmatpush1.msra.mxu0 %v2008_v29  ;;  %2620 = vmatpush1.msra.mxu1 %v2010_v30 }
 0x237   : > { %2550 = vmatprep.subr.mxu0 %v1993_v33  ;;  %2621 = vmatprep.subr.mxu1 %v1995_v36 }
 0x238   : > { %2551 = vmatpush1.msra.mxu0 %v1992_v34  ;;  %2622 = vmatpush1.msra.mxu1 %v1994_v35 }
 0x239   : > { %2552 = vmatprep.subr.mxu0 %v1977_v39  ;;  %2623 = vmatprep.subr.mxu1 %v1979_v40 }
 0x23a   : > { %2553 = vmatpush1.msra.mxu0 %v1976_v41  ;;  %2624 = vmatpush1.msra.mxu1 %v1978_v42 }
 0x23b   : > { %3008 = vmatmul.mubr.msk.f32.vlgmr.msra.gmra.mxu0 %vm1139_vm3, %v3771_v55  ;;  %3011 = vmatmul.mubr.msk.f32.vlgmr.msra.gmra.mxu1 %vm1139_vm3, %v3771_v55 }
 0x2b9   : > { %v2162_v45 = vpop.f32.mrf.mxu0  ;;  %v2233_v31 = vpop.f32.mrf.mxu1 }
 0x2bb   : > { %v2164_v27 = vpop.f32.mrf.mxu0  ;;  %v2235_v48 = vpop.f32.mrf.mxu1 }
 0x2bc   : > { %v2680_v49 = vcombine.low %v2162_v45, %v2164_v27  ;;  %v2681_v51 = vcombine.low %v2233_v31, %v2235_v48 }
 0x2be   : > { %v2690_v54 = vrot.slane %v2680_v49, %v2689_v50  ;;  %v2697_v56 = vrot.slane %v2681_v51, %v2689_v50 }
 0x2c0   : > { %v2712_v55 = vcombine.low %v2690_v54, %v2697_v56 }
 0x2c2   : > { %v2720_v47 = vrot.slane %v2712_v55, %v2689_v50 }
 0x2cf   : > { %v2304_v57 = vpop.f32.mrf.mxu0  ;;  %v2375_v60 = vpop.f32.mrf.mxu1 }
 0x2d1   : > { %v2306_v58 = vpop.f32.mrf.mxu0  ;;  %v2377_v59 = vpop.f32.mrf.mxu1 }
 0x2d2   : > { %v2682_v61 = vcombine.low %v2304_v57, %v2306_v58  ;;  %v2683_v52 = vcombine.low %v2375_v60, %v2377_v59 }
 0x2d4   : > { %v2704_v53 = vrot.slane %v2682_v61, %v2689_v50  ;;  %v2711_v46 = vrot.slane %v2683_v52, %v2689_v50 }
 0x2d6   : > { %v2713_v62 = vcombine.low %v2704_v53, %v2711_v46 }
 0x2d8   : > { %v2727_v63 = vrot.slane %v2713_v62, %v2689_v50 }
 0x2da   : > { %v2728_v1 = vcombine.low %v2720_v47, %v2727_v63 }
 0x2dc   : > { %2780 = vst [vmem:[%s213_s23] sm:$0xff] %v2728_v1 }
 0x2e5   : > { %v2446_v2 = vpop.f32.mrf.mxu0  ;;  %v2517_v9 = vpop.f32.mrf.mxu1 }
 0x2e7   : > { %v2448_v14 = vpop.f32.mrf.mxu0  ;;  %v2519_v19 = vpop.f32.mrf.mxu1 }
 0x2e8   : > { %v2729_v28 = vcombine.low %v2446_v2, %v2448_v14  ;;  %v2730_v3 = vcombine.low %v2517_v9, %v2519_v19 }
 0x2ea   : > { %v2739_v5 = vrot.slane %v2729_v28, %v2689_v50  ;;  %v2746_v6 = vrot.slane %v2730_v3, %v2689_v50 }
 0x2ec   : > { %v2761_v12 = vcombine.low %v2739_v5, %v2746_v6 }
 0x2ee   : > { %v2769_v17 = vrot.slane %v2761_v12, %v2689_v50 }
 0x2fb   : > { %v2588_v4 = vpop.f32.mrf.mxu0  ;;  %v2659_v7 = vpop.f32.mrf.mxu1 }
 0x2fd   : > { %v2590_v8 = vpop.f32.mrf.mxu0  ;;  %v2661_v10 = vpop.f32.mrf.mxu1 }
 0x2fe   : > { %v2731_v43 = vcombine.low %v2588_v4, %v2590_v8  ;;  %v2732_v11 = vcombine.low %v2659_v7, %v2661_v10 }
 0x300   : > { %v2753_v13 = vrot.slane %v2731_v43, %v2689_v50  ;;  %v2760_v15 = vrot.slane %v2732_v11, %v2689_v50 }
 0x302   : > { %v2762_v16 = vcombine.low %v2753_v13, %v2760_v15 }
 0x304   : > { %v2776_v18 = vrot.slane %v2762_v16, %v2689_v50 }
 0x306   : > { %v2777_v20 = vcombine.low %v2769_v17, %v2776_v18 }
 0x308   : > { %2781 = vst [vmem:[%s213_s23 + $0x8] sm:$0xff] %v2777_v20 }
 0x309   : > { %3116 = shalt.err (!%p3113_p10)
}
 0x30a   : > { %s3117_s26 = scalar_lea.hbm %s2795_s6, 256  ;;  %s3121_s11 = scalar_lea.hbm %s3889_s4, 512 }
 0x30b   : > { %p3118_p2 = scmp.ne.s32.totalorder %s2795_s6, %s3117_s26  ;;  %p3122_p7 = scmp.lt.s32.totalorder %s2795_s6, %s3889_s4 }
 0x30c   : > { %p3123_p0 = scmp.lt.s32.totalorder %s3121_s11, %s3117_s26 }
 0x30d   : > { %p3119_p4 = pnand %p3118_p2, %p3900_p12 }
 0x30e   : > { %p3124_p6 = por %p3123_p0, %p3122_p7 }
 0x30f   : > { %p3120_p9 = pneg %p3119_p4 }
 0x311   : > { %p3125_p11 = pnand %p3124_p6, %p3120_p9 }
 0x313   : > { %3128 = shalt.err (!%p3125_p11)
}
 0x314   : > { %3021 = dma.vmem_to_hbm [thread:$0]  (%p3900_p12), %s2798_s29, 256, %s2795_s6, %s2783_s9  }
 0x315 PF: > { %s2809_s22 = sand.u32 1, %s3155_s15   ;;  %p3901_p13 = scmp.ne.s32.totalorder %s3895_s28, 0 }
 0x316   : > { %p3902_p1 = scmp.ge.s32.totalorder %s3167_s18, 2  ;;  %s2810_s23 = scalar_lea.sflag [#allocation4], %s2809_s22 }
 0x318   : > { %p3028_p3 = pnand %p3902_p1, %p3901_p13 }
 0x31a   : > { %p3029_p5 = pneg %p3028_p3 }
 0x31c   : > { %3150 = dma.done.wait (%p3029_p5), %s2810_s23, 256  }
 0x31d   : > { %3152 = vsyncadd (%p3029_p5), %s2810_s23, 4294967040  ;;  %p17_p8 = scmp.ge.s32.totalorder %s3223_s21, 4   ;;  %s3903_s15 = smov %s3159_s16 }
 0x31e   : > { %s3904_s16 = smov %s3163_s17  ;;  %s3905_s17 = smov %s3235_s24 }
 0x31f   : > { %s3906_s18 = smov %s3223_s21  ;;  %19 = sbr.rel (!%p17_p8) target bundleno = 5 (0x5), region = 81 }
 0x324   :  { %2815 = vsyncpa [#allocation3], 1 }
 0x325   :  { %2817 = vsyncpa [#allocation3 + $0x1], 1 }
 0x326   :  { %2818 = vsyncpa [#allocation4], 1 }
 0x327   :  { %2820 = vsyncpa [#allocation4 + $0x1], 1 }

</bundles_post_ra>
